<compile_context>
chip_gen: v7x
topology: tpu7x:2x2x1
jax: 0.10.0
libtpu: 0.0.40
codegen_flags: <defaults>
</compile_context>

<pallas_src>
import jax
import jax.numpy as jnp
from jax.experimental import pallas as pl
from jax.experimental.pallas import tpu as pltpu

K_IN = 28 * 28          # 784
K_PAD = 896             # 7 * 128, lane-aligned K for layer 1
N_HID = 64
N_OUT = 10
N_OUT_PAD = 128         # lane-dense output width


def _round_up(n, m):
    return ((n + m - 1) // m) * m


def mlp_kernel(x_ref, w1_ref, b1_ref, w2_ref, b2_ref, w3_ref, b3_ref, o_ref):
    # Layer 1: (TB,896) bf16 @ (896,64) bf16 -> f32 acc, +bias, ReLU (f32)
    h1 = jnp.dot(x_ref[...], w1_ref[...], preferred_element_type=jnp.float32)
    h1 = jnp.maximum(h1 + b1_ref[...], 0.0)
    # Layer 2: (TB,64) @ (64,64) -> f32 acc, +bias, ReLU. Tiny dot = MXU filler.
    h2 = jnp.dot(h1.astype(jnp.bfloat16), w2_ref[...],
                 preferred_element_type=jnp.float32)
    h2 = jnp.maximum(h2 + b2_ref[...], 0.0)
    # Layer 3: (TB,64) @ (64,128) -> f32 acc, +bias. Output block is lane-dense.
    logits = jnp.dot(h2.astype(jnp.bfloat16), w3_ref[...],
                     preferred_element_type=jnp.float32)
    o_ref[...] = (logits + b3_ref[...]).astype(o_ref.dtype)


def mynn_forward(x, params, *, tb_target=1024):
    """x: (B, 1, 28, 28) float32 (NCHW). Returns logits (B, 10) float32."""
    w1, b1, w2, b2, w3, b3 = params
    B = x.shape[0]

    # --- wrapper-side layout / dtype prep (cheap XLA ops) -------------------
    x_flat = x.reshape(B, -1).astype(jnp.bfloat16)                       # (B, 784)

    tb = min(tb_target, _round_up(B, 8))       # tile rows, multiple of 8
    tb = _round_up(tb, 8)
    b_pad = _round_up(B, tb)

    x_pad = jnp.pad(x_flat, ((0, b_pad - B), (0, K_PAD - K_IN)))         # (B_pad, 896)
    w1p = jnp.pad(w1.astype(jnp.bfloat16), ((0, K_PAD - K_IN), (0, 0)))  # (896, 64)
    w2b = w2.astype(jnp.bfloat16)                                        # (64, 64)
    w3p = jnp.pad(w3.astype(jnp.bfloat16),
                  ((0, 0), (0, N_OUT_PAD - N_OUT)))                      # (64, 128)
    b3p = jnp.pad(b3, ((0, 0), (0, N_OUT_PAD - N_OUT)))                  # (1, 128) f32

    grid = (b_pad // tb,)

    def resident(shape):
        # Same block every grid step -> stays in VMEM, no re-DMA.
        return pl.BlockSpec(shape, lambda i: tuple(0 for _ in shape))

    flops = 2 * b_pad * (K_PAD * N_HID + N_HID * N_HID + N_HID * N_OUT_PAD)
    bytes_accessed = (
        x_pad.size * 2
        + w1p.size * 2 + w2b.size * 2 + w3p.size * 2
        + b1.size * 4 + b2.size * 4 + b3p.size * 4
        + b_pad * N_OUT_PAD * 4
    )

    out = pl.pallas_call(
        mlp_kernel,
        out_shape=jax.ShapeDtypeStruct((b_pad, N_OUT_PAD), jnp.float32),
        grid=grid,
        in_specs=[
            pl.BlockSpec((tb, K_PAD), lambda i: (i, 0)),   # x tile streams per step
            resident(w1p.shape),
            resident(b1.shape),
            resident(w2b.shape),
            resident(b2.shape),
            resident(w3p.shape),
            resident(b3p.shape),
        ],
        out_specs=pl.BlockSpec((tb, N_OUT_PAD), lambda i: (i, 0)),
        compiler_params=pltpu.CompilerParams(
            dimension_semantics=("parallel",),
        ),
        cost_estimate=pl.CostEstimate(
            flops=flops, transcendentals=0, bytes_accessed=bytes_accessed),
    )(x_pad, w1p, b1, w2b, b2, w3p, b3p)

    return out[:B, :N_OUT]


def init_params(key):
    """Deterministic init mimicking torch.nn.Linear (uniform(+-1/sqrt(fan_in)))."""
    dims = [(K_IN, 64), (64, 64), (64, N_OUT)]
    params = []
    for fan_in, fan_out in dims:
        kw, kb, key = jax.random.split(key, 3)
        bound = 1.0 / jnp.sqrt(float(fan_in))
        # stored as (in, out) so kernel does x @ W
        w = jax.random.uniform(kw, (fan_in, fan_out), jnp.float32, -bound, bound)
        b = jax.random.uniform(kb, (1, fan_out), jnp.float32, -bound, bound)
        params += [w, b]
    return tuple(params)


def reference_forward(x, params):
    """Pure f32 reference of the original torch module."""
    w1, b1, w2, b2, w3, b3 = params
    xf = x.reshape(x.shape[0], -1)
    h1 = jnp.maximum(xf @ w1 + b1, 0.0)
    h2 = jnp.maximum(h1 @ w2 + b2, 0.0)
    return h2 @ w3 + b3


if __name__ == "__main__":
    key = jax.random.PRNGKey(0)
    kx, kp = jax.random.split(key)
    params = init_params(kp)

    # Small MNIST-like input (B, C=1, H=28, W=28), single grid step.
    x = jax.random.normal(kx, (4, 1, 28, 28), jnp.float32)
    logits = jax.block_until_ready(mynn_forward(x, params))
    ref = reference_forward(x, params)
    assert logits.shape == (4, 10), logits.shape
    # bf16 inputs/weights with f32 accumulation -> loosen tolerance vs f32 ref.
    assert jnp.allclose(logits, ref, atol=2e-2, rtol=2e-2), "mismatch vs reference (B=4)"

    # Second run: non-multiple batch + small tile exercises the multi-step grid
    # and the padding / tail handling.
    x2 = jax.random.normal(jax.random.PRNGKey(1), (52, 1, 28, 28), jnp.float32)
    logits2 = jax.block_until_ready(mynn_forward(x2, params, tb_target=16))
    ref2 = reference_forward(x2, params)
    assert logits2.shape == (52, 10), logits2.shape
    assert jnp.allclose(logits2, ref2, atol=2e-2, rtol=2e-2), "mismatch vs reference (B=52)"

    print("KERNEL_OK")
</pallas_src>

<mosaic_0001>
module attributes {stable_mosaic.version = 11 : i64} {
  func.func @mlp_kernel(%arg0: i32, %arg1: memref<8x896xbf16, #tpu.memory_space<vmem>>, %arg2: memref<896x64xbf16, #tpu.memory_space<vmem>>, %arg3: memref<1x64xf32, #tpu.memory_space<vmem>>, %arg4: memref<64x64xbf16, #tpu.memory_space<vmem>>, %arg5: memref<1x64xf32, #tpu.memory_space<vmem>>, %arg6: memref<64x128xbf16, #tpu.memory_space<vmem>>, %arg7: memref<1x128xf32, #tpu.memory_space<vmem>>, %arg8: memref<8x128xf32, #tpu.memory_space<vmem>>) attributes {dimension_semantics = [#tpu.dimension_semantics<parallel>], iteration_bounds = array<i64: 1>, scalar_prefetch = 0 : i64, scratch_operands = 0 : i64, tpu.core_type = #tpu.core_type<tc>, window_params = [{transform_indices = @transform_0, window_bounds = array<i64: 8, 896>}, {pipeline_mode = #tpu.pipeline_mode<synchronous>, transform_indices = @transform_1, window_bounds = array<i64: 896, 64>}, {pipeline_mode = #tpu.pipeline_mode<synchronous>, transform_indices = @transform_2, window_bounds = array<i64: 1, 64>}, {pipeline_mode = #tpu.pipeline_mode<synchronous>, transform_indices = @transform_3, window_bounds = array<i64: 64, 64>}, {pipeline_mode = #tpu.pipeline_mode<synchronous>, transform_indices = @transform_4, window_bounds = array<i64: 1, 64>}, {pipeline_mode = #tpu.pipeline_mode<synchronous>, transform_indices = @transform_5, window_bounds = array<i64: 64, 128>}, {pipeline_mode = #tpu.pipeline_mode<synchronous>, transform_indices = @transform_6, window_bounds = array<i64: 1, 128>}, {transform_indices = @transform_7, window_bounds = array<i64: 8, 128>}]} {
    %c0 = arith.constant 0 : index
    %c0_0 = arith.constant 0 : index
    %0 = vector.load %arg1[%c0, %c0_0] : memref<8x896xbf16, #tpu.memory_space<vmem>>, vector<8x896xbf16>
    %c0_1 = arith.constant 0 : index
    %c0_2 = arith.constant 0 : index
    %1 = vector.load %arg2[%c0_1, %c0_2] : memref<896x64xbf16, #tpu.memory_space<vmem>>, vector<896x64xbf16>
    %cst = arith.constant dense<0.000000e+00> : vector<8x64xf32>
    %2 = tpu.matmul %0, %1, %cst {dimension_numbers = #tpu.dot_dimension_numbers<[1], [0], [0], [1], [0, 0, 1, 1], [], []>} : vector<8x896xbf16>, vector<896x64xbf16>, vector<8x64xf32> -> vector<8x64xf32>
    %c0_3 = arith.constant 0 : index
    %c0_4 = arith.constant 0 : index
    %3 = vector.load %arg3[%c0_3, %c0_4] : memref<1x64xf32, #tpu.memory_space<vmem>>, vector<1x64xf32>
    %4 = vector.broadcast %3 : vector<1x64xf32> to vector<8x64xf32>
    %5 = arith.addf %2, %4 : vector<8x64xf32>
    %cst_5 = arith.constant 0.000000e+00 : f32
    %6 = vector.broadcast %cst_5 : f32 to vector<8x64xf32>
    %7 = arith.maximumf %5, %6 : vector<8x64xf32>
    %8 = arith.truncf %7 : vector<8x64xf32> to vector<8x64xbf16>
    %c0_6 = arith.constant 0 : index
    %c0_7 = arith.constant 0 : index
    %9 = vector.load %arg4[%c0_6, %c0_7] : memref<64x64xbf16, #tpu.memory_space<vmem>>, vector<64x64xbf16>
    %cst_8 = arith.constant dense<0.000000e+00> : vector<8x64xf32>
    %10 = tpu.matmul %8, %9, %cst_8 {dimension_numbers = #tpu.dot_dimension_numbers<[1], [0], [0], [1], [0, 0, 1, 1], [], []>} : vector<8x64xbf16>, vector<64x64xbf16>, vector<8x64xf32> -> vector<8x64xf32>
    %c0_9 = arith.constant 0 : index
    %c0_10 = arith.constant 0 : index
    %11 = vector.load %arg5[%c0_9, %c0_10] : memref<1x64xf32, #tpu.memory_space<vmem>>, vector<1x64xf32>
    %12 = vector.broadcast %11 : vector<1x64xf32> to vector<8x64xf32>
    %13 = arith.addf %10, %12 : vector<8x64xf32>
    %cst_11 = arith.constant 0.000000e+00 : f32
    %14 = vector.broadcast %cst_11 : f32 to vector<8x64xf32>
    %15 = arith.maximumf %13, %14 : vector<8x64xf32>
    %16 = arith.truncf %15 : vector<8x64xf32> to vector<8x64xbf16>
    %c0_12 = arith.constant 0 : index
    %c0_13 = arith.constant 0 : index
    %17 = vector.load %arg6[%c0_12, %c0_13] : memref<64x128xbf16, #tpu.memory_space<vmem>>, vector<64x128xbf16>
    %cst_14 = arith.constant dense<0.000000e+00> : vector<8x128xf32>
    %18 = tpu.matmul %16, %17, %cst_14 {dimension_numbers = #tpu.dot_dimension_numbers<[1], [0], [0], [1], [0, 0, 1, 1], [], []>} : vector<8x64xbf16>, vector<64x128xbf16>, vector<8x128xf32> -> vector<8x128xf32>
    %c0_15 = arith.constant 0 : index
    %c0_16 = arith.constant 0 : index
    %19 = vector.load %arg7[%c0_15, %c0_16] : memref<1x128xf32, #tpu.memory_space<vmem>>, vector<1x128xf32>
    %20 = vector.broadcast %19 : vector<1x128xf32> to vector<8x128xf32>
    %21 = arith.addf %18, %20 : vector<8x128xf32>
    %c0_17 = arith.constant 0 : index
    %c0_18 = arith.constant 0 : index
    %22 = vector.load %arg8[%c0_17, %c0_18] : memref<8x128xf32, #tpu.memory_space<vmem>>, vector<8x128xf32>
    tpu.vector_store %arg8[%c0_17, %c0_18], %21 {strides = array<i32>} : memref<8x128xf32, #tpu.memory_space<vmem>>, vector<8x128xf32>,
    return
  }
  func.func @transform_0(%arg0: i32) -> (i32, i32) {
    %c0_i32 = arith.constant 0 : i32
    %c0_i32_0 = arith.constant 0 : i32
    return %arg0, %c0_i32 : i32, i32
  }
  func.func @transform_1(%arg0: i32) -> (i32, i32) {
    %c0_i32 = arith.constant 0 : i32
    %c0_i32_0 = arith.constant 0 : i32
    %c0_i32_1 = arith.constant 0 : i32
    return %c0_i32, %c0_i32_0 : i32, i32
  }
  func.func @transform_2(%arg0: i32) -> (i32, i32) {
    %c0_i32 = arith.constant 0 : i32
    %c0_i32_0 = arith.constant 0 : i32
    %c0_i32_1 = arith.constant 0 : i32
    return %c0_i32, %c0_i32_0 : i32, i32
  }
  func.func @transform_3(%arg0: i32) -> (i32, i32) {
    %c0_i32 = arith.constant 0 : i32
    %c0_i32_0 = arith.constant 0 : i32
    %c0_i32_1 = arith.constant 0 : i32
    return %c0_i32, %c0_i32_0 : i32, i32
  }
  func.func @transform_4(%arg0: i32) -> (i32, i32) {
    %c0_i32 = arith.constant 0 : i32
    %c0_i32_0 = arith.constant 0 : i32
    %c0_i32_1 = arith.constant 0 : i32
    return %c0_i32, %c0_i32_0 : i32, i32
  }
  func.func @transform_5(%arg0: i32) -> (i32, i32) {
    %c0_i32 = arith.constant 0 : i32
    %c0_i32_0 = arith.constant 0 : i32
    %c0_i32_1 = arith.constant 0 : i32
    return %c0_i32, %c0_i32_0 : i32, i32
  }
  func.func @transform_6(%arg0: i32) -> (i32, i32) {
    %c0_i32 = arith.constant 0 : i32
    %c0_i32_0 = arith.constant 0 : i32
    %c0_i32_1 = arith.constant 0 : i32
    return %c0_i32, %c0_i32_0 : i32, i32
  }
  func.func @transform_7(%arg0: i32) -> (i32, i32) {
    %c0_i32 = arith.constant 0 : i32
    %c0_i32_0 = arith.constant 0 : i32
    return %arg0, %c0_i32 : i32, i32
  }
}

</mosaic_0001>

<bundles_post_ra>
// kernel: tpu_custom_call.1
= control target key start
LH: loop header
LB: loop body
LE: loop exit
PB: predicated region body
PF: predicated region fallthrough
CT: control target
= control target key end

     0   :  { %v1159_v42 = vmov 0.0   ;;  %vm1160_vm0 = vmmov 0   ;;  %s1451_s0 = inlined_call_operand.vmem [shape: bf16[8,896], index: 0, kind: input, shape index: {}]   ;;  %s1452_s1 = inlined_call_operand.vmem [shape: bf16[896,64], index: 1, kind: input, shape index: {}]   ;;  %s1453_s2 = inlined_call_operand.vmem [shape: f32[1,64], index: 2, kind: input, shape index: {}]   ;;  %s1454_s3 = inlined_call_operand.vmem [shape: bf16[64,64], index: 3, kind: input, shape index: {}]   ;;  %s1455_s4 = inlined_call_operand.vmem [shape: f32[1,64], index: 4, kind: input, shape index: {}]   ;;  %s1456_s5 = inlined_call_operand.vmem [shape: bf16[64,128], index: 5, kind: input, shape index: {}]   ;;  %s1457_s6 = inlined_call_operand.vmem [shape: f32[1,128], index: 6, kind: input, shape index: {}]   ;;  %s1458_s7 = inlined_call_operand.hbm [shape: f32[8,128], index: 7, kind: output, shape index: {}]  }
   0x1   :  { %v1064_v0 = vld [vmem:[%s1452_s1 + $0x40] sm:$0xff]   ;;  %v1068_v4 = vld [vmem:[%s1452_s1 + $0x48] sm:$0xff]   ;;  %v1072_v8 = vld [vmem:[%s1452_s1 + $0x50] sm:$0xff]  }
   0x2   :  { %v1065_v1 = vld [vmem:[%s1452_s1] sm:$0xff]   ;;  %932 = vmatprep.subr.bf16.mxu0 %v1064_v0  ;;  %v1069_v5 = vld [vmem:[%s1452_s1 + $0x8] sm:$0xff]   ;;  %v1073_v9 = vld [vmem:[%s1452_s1 + $0x10] sm:$0xff]  }
   0x3   :  { %v1066_v2 = vld [vmem:[%s1452_s1 + $0xc0] sm:$0xff]   ;;  %933 = vmatpush3.bf16.msra.mxu0 %v1065_v1  ;;  %v1070_v6 = vld [vmem:[%s1452_s1 + $0xc8] sm:$0xff]   ;;  %v1074_v10 = vld [vmem:[%s1452_s1 + $0xd0] sm:$0xff]  }
   0x4   :  { %v1067_v3 = vld [vmem:[%s1452_s1 + $0x80] sm:$0xff]   ;;  %954 = vmatprep.subr.bf16.mxu1 %v1066_v2  ;;  %934 = vmatprep.subr.bf16.mxu0 %v1068_v4  ;;  %v1071_v7 = vld [vmem:[%s1452_s1 + $0x88] sm:$0xff]   ;;  %v1075_v11 = vld [vmem:[%s1452_s1 + $0x90] sm:$0xff]  }
   0x5   :  { %955 = vmatpush3.bf16.msra.mxu1 %v1067_v3  ;;  %v1076_v12 = vld [vmem:[%s1452_s1 + $0x58] sm:$0xff]   ;;  %v1080_v16 = vld [vmem:[%s1452_s1 + $0x60] sm:$0xff]   ;;  %v1084_v20 = vld [vmem:[%s1452_s1 + $0x68] sm:$0xff]  }
   0x6   :  { %956 = vmatprep.subr.bf16.mxu1 %v1070_v6  ;;  %v1077_v13 = vld [vmem:[%s1452_s1 + $0x18] sm:$0xff]   ;;  %v1081_v17 = vld [vmem:[%s1452_s1 + $0x20] sm:$0xff]   ;;  %v1085_v21 = vld [vmem:[%s1452_s1 + $0x28] sm:$0xff]  }
   0x7   :  { %935 = vmatpush3.bf16.msra.mxu0 %v1069_v5  ;;  %v1078_v14 = vld [vmem:[%s1452_s1 + $0xd8] sm:$0xff]   ;;  %v1082_v18 = vld [vmem:[%s1452_s1 + $0xe0] sm:$0xff]   ;;  %v1086_v22 = vld [vmem:[%s1452_s1 + $0xe8] sm:$0xff]  }
   0x8   :  { %936 = vmatprep.subr.bf16.mxu0 %v1072_v8  ;;  %v1079_v15 = vld [vmem:[%s1452_s1 + $0x98] sm:$0xff]   ;;  %v1083_v19 = vld [vmem:[%s1452_s1 + $0xa0] sm:$0xff]   ;;  %v1087_v23 = vld [vmem:[%s1452_s1 + $0xa8] sm:$0xff]  }
   0x9   :  { %957 = vmatpush3.bf16.msra.mxu1 %v1071_v7  ;;  %v1088_v24 = vld [vmem:[%s1452_s1 + $0x70] sm:$0xff]   ;;  %v1092_v28 = vld [vmem:[%s1452_s1 + $0x78] sm:$0xff]   ;;  %v28_v31 = vld [vmem:[%s1451_s0] sm:$0xff] }
   0xa   :  { %958 = vmatprep.subr.bf16.mxu1 %v1074_v10  ;;  %v1089_v25 = vld [vmem:[%s1452_s1 + $0x30] sm:$0xff]   ;;  %v1093_v29 = vld [vmem:[%s1452_s1 + $0x38] sm:$0xff]   ;;  %v857_v32 = vcombine.low %v28_v31, %v28_v31  ;;  %v858_v33 = vcombine.high %v28_v31, %v28_v31  ;;  %v1098_v35 = vld [vmem:[%s1452_s1 + $0x140] sm:$0xff]  }
   0xb   :  { %937 = vmatpush3.bf16.msra.mxu0 %v1073_v9  ;;  %v1090_v26 = vld [vmem:[%s1452_s1 + $0xf0] sm:$0xff]   ;;  %v1094_v30 = vld [vmem:[%s1452_s1 + $0xf8] sm:$0xff]   ;;  %v29_v36 = vld [vmem:[%s1451_s0 + $0x8] sm:$0xff] }
   0xc   :  { %938 = vmatprep.subr.bf16.mxu0 %v1076_v12  ;;  %v1091_v27 = vld [vmem:[%s1452_s1 + $0xb0] sm:$0xff]   ;;  %v1097_v34 = vld [vmem:[%s1452_s1 + $0xb8] sm:$0xff]   ;;  %544 = vmatprep.mubr.bf16.mxu0 %v858_v33  ;;  %v859_v37 = vcombine.low %v29_v36, %v29_v36  ;;  %v860_v38 = vcombine.high %v29_v36, %v29_v36  ;;  %v1101_v39 = vld [vmem:[%s1452_s1 + $0x100] sm:$0xff]  }
   0xd   :  { %959 = vmatpush3.bf16.msra.mxu1 %v1075_v11  ;;  %v1102_v40 = vld [vmem:[%s1452_s1 + $0x180] sm:$0xff]   ;;  %v1103_v41 = vld [vmem:[%s1452_s1 + $0x148] sm:$0xff]   ;;  %v1106_v45 = vld [vmem:[%s1452_s1 + $0x150] sm:$0xff]  }
   0xe   :  { %960 = vmatprep.subr.bf16.mxu1 %v1078_v14  ;;  %584 = vmatprep.mubr.bf16.mxu1 %v860_v38  ;;  %v1104_v43 = vld [vmem:[%s1452_s1 + $0x108] sm:$0xff]   ;;  %v1107_v46 = vld [vmem:[%s1452_s1 + $0x110] sm:$0xff]   ;;  %v1109_v48 = vld [vmem:[%s1452_s1 + $0x158] sm:$0xff]  }
   0xf   :  { %939 = vmatpush3.bf16.msra.mxu0 %v1077_v13  ;;  %v1105_v44 = vld [vmem:[%s1452_s1 + $0x188] sm:$0xff]   ;;  %v1108_v47 = vld [vmem:[%s1452_s1 + $0x190] sm:$0xff]   ;;  %v1110_v49 = vld [vmem:[%s1452_s1 + $0x118] sm:$0xff]  }
  0x10   :  { %940 = vmatprep.subr.bf16.mxu0 %v1080_v16  ;;  %v1112_v50 = vld [vmem:[%s1452_s1 + $0x160] sm:$0xff]   ;;  %v1111_v51 = vld [vmem:[%s1452_s1 + $0x198] sm:$0xff]   ;;  %v1115_v53 = vld [vmem:[%s1452_s1 + $0x168] sm:$0xff]  }
  0x11   :  { %961 = vmatpush3.bf16.msra.mxu1 %v1079_v15  ;;  %v1113_v52 = vld [vmem:[%s1452_s1 + $0x120] sm:$0xff]   ;;  %v1116_v55 = vld [vmem:[%s1452_s1 + $0x128] sm:$0xff]   ;;  %v1118_v56 = vld [vmem:[%s1452_s1 + $0x170] sm:$0xff]  }
  0x12   :  { %962 = vmatprep.subr.bf16.mxu1 %v1082_v18  ;;  %v1114_v54 = vld [vmem:[%s1452_s1 + $0x1a0] sm:$0xff]   ;;  %v1117_v57 = vld [vmem:[%s1452_s1 + $0x1a8] sm:$0xff]   ;;  %v1119_v58 = vld [vmem:[%s1452_s1 + $0x130] sm:$0xff]  }
  0x13   :  { %941 = vmatpush3.bf16.msra.mxu0 %v1081_v17  ;;  %v30_v59 = vld [vmem:[%s1451_s0 + $0x10] sm:$0xff]  ;;  %v1121_v62 = vld [vmem:[%s1452_s1 + $0x178] sm:$0xff]  }
  0x14   :  { %942 = vmatprep.subr.bf16.mxu0 %v1084_v20  ;;  %v1120_v60 = vld [vmem:[%s1452_s1 + $0x1b0] sm:$0xff]   ;;  %v862_v61 = vcombine.high %v30_v59, %v30_v59  ;;  %v1122_v63 = vld [vmem:[%s1452_s1 + $0x138] sm:$0xff]   ;;  %v861_v1 = vcombine.low %v30_v59, %v30_v59 }
  0x15   :  { %963 = vmatpush3.bf16.msra.mxu1 %v1083_v19  ;;  %v1125_v0 = vld [vmem:[%s1452_s1 + $0x1b8] sm:$0xff]  }
  0x16   :  { %964 = vmatprep.subr.bf16.mxu1 %v1086_v22 }
  0x17   :  { %943 = vmatpush3.bf16.msra.mxu0 %v1085_v21 }
  0x18   :  { %944 = vmatprep.subr.bf16.mxu0 %v1088_v24 }
  0x19   :  { %965 = vmatpush3.bf16.msra.mxu1 %v1087_v23 }
  0x1a   :  { %966 = vmatprep.subr.bf16.mxu1 %v1090_v26 }
  0x1b   :  { %945 = vmatpush3.bf16.msra.mxu0 %v1089_v25 }
  0x1c   :  { %946 = vmatprep.subr.bf16.mxu0 %v1092_v28 }
  0x1d   :  { %967 = vmatpush3.bf16.msra.mxu1 %v1091_v27 }
  0x1e   :  { %968 = vmatprep.subr.bf16.mxu1 %v1094_v30 }
  0x1f   :  { %947 = vmatpush3.bf16.msra.mxu0 %v1093_v29 }
  0x20   :  { %976 = vmatprep.subr.bf16.mxu0 %v1098_v35 }
  0x21   :  { %969 = vmatpush3.bf16.msra.mxu1 %v1097_v34 }
  0x22   :  { %545 = vmatmul.mubr.bf16.vlgmr.msra.gmra.mrb[0].mxu0 %v857_v32  ;;  %1017 = vmatprep.subr.bf16.mxu1 %v1159_v42 }
  0x23   :  { %977 = vmatpush3.bf16.msra.mxu0 %v1101_v39  ;;  %624 = vmatprep.mubr.bf16.mxu0 %v862_v61 }
  0x24   :  { %585 = vmatmul.mubr.bf16.vlgmr.msra.gmra.mrb[0].mxu1 %v859_v37  ;;  %978 = vmatprep.subr.bf16.mxu0 %v1103_v41 }
  0x25   :  { %1018 = vmatpush3.bf16.msra.mxu1 %v1102_v40  ;;  %1033 = vmatprep.mubr.msk.bf16.mxu1 %vm1160_vm0, %v1159_v42 }
  0x26   :  { %1019 = vmatprep.subr.bf16.mxu1 %v1159_v42 }
  0x27   :  { %979 = vmatpush3.bf16.msra.mxu0 %v1104_v43 }
  0x28   :  { %980 = vmatprep.subr.bf16.mxu0 %v1106_v45 }
  0x29   :  { %1020 = vmatpush3.bf16.msra.mxu1 %v1105_v44 }
  0x2a   :  { %1021 = vmatprep.subr.bf16.mxu1 %v1159_v42 }
  0x2b   :  { %981 = vmatpush3.bf16.msra.mxu0 %v1107_v46 }
  0x2c   :  { %982 = vmatprep.subr.bf16.mxu0 %v1109_v48 }
  0x2d   :  { %1022 = vmatpush3.bf16.msra.mxu1 %v1108_v47 }
  0x2e   :  { %1023 = vmatprep.subr.bf16.mxu1 %v1159_v42 }
  0x2f   :  { %983 = vmatpush3.bf16.msra.mxu0 %v1110_v49 }
  0x30   :  { %984 = vmatprep.subr.bf16.mxu0 %v1112_v50 }
  0x31   :  { %1024 = vmatpush3.bf16.msra.mxu1 %v1111_v51 }
  0x32   :  { %1025 = vmatprep.subr.bf16.mxu1 %v1159_v42 }
  0x33   :  { %985 = vmatpush3.bf16.msra.mxu0 %v1113_v52 }
  0x34   :  { %986 = vmatprep.subr.bf16.mxu0 %v1115_v53 }
  0x35   :  { %1026 = vmatpush3.bf16.msra.mxu1 %v1114_v54 }
  0x36   :  { %1027 = vmatprep.subr.bf16.mxu1 %v1159_v42 }
  0x37   :  { %987 = vmatpush3.bf16.msra.mxu0 %v1116_v55 }
  0x38   :  { %988 = vmatprep.subr.bf16.mxu0 %v1118_v56 }
  0x39   :  { %1028 = vmatpush3.bf16.msra.mxu1 %v1117_v57 }
  0x3a   :  { %1029 = vmatprep.subr.bf16.mxu1 %v1159_v42 }
  0x3b   :  { %989 = vmatpush3.bf16.msra.mxu0 %v1119_v58 }
  0x3c   :  { %990 = vmatprep.subr.bf16.mxu0 %v1121_v62 }
  0x3d   :  { %1030 = vmatpush3.bf16.msra.mxu1 %v1120_v60 }
  0x3e   :  { %1031 = vmatprep.subr.bf16.mxu1 %v1159_v42 }
  0x3f   :  { %12 = vsyncpa [#allocation3], 0  ;;  %991 = vmatpush3.bf16.msra.mxu0 %v1122_v63  ;;  %v1126_v2 = vld [vmem:[%s1451_s0 + $0x18] ss:$0 sps:$4 sm:$0xff]   ;;  %v1127_v3 = vld [vmem:[%s1454_s3] sm:$0xff]   ;;  %vm713_vm1 = vcmask 523264  }
  0x40   :  { %1037 = vmatprep.subr.bf16.mxu0 %v1159_v42  ;;  %v1128_v4 = vld [vmem:[%s1454_s3 + $0x8] sm:$0xff]   ;;  %v1129_v5 = vld [vmem:[%s1454_s3 + $0x10] sm:$0xff]   ;;  %v1130_v6 = vld [vmem:[%s1454_s3 + $0x18] sm:$0xff]   ;;  %s1161_s24 = smov [#allocation2]  }
  0x41   :  { %1032 = vmatpush3.bf16.msra.mxu1 %v1125_v0  ;;  %v1131_v7 = vld [vmem:[%s1456_s5] sm:$0xff]   ;;  %v1132_v8 = vld [vmem:[%s1456_s5 + $0x8] sm:$0xff]   ;;  %v1133_v35 = vld [vmem:[%s1456_s5 + $0x10] sm:$0xff]  }
  0x42   :  { %625 = vmatmul.mubr.bf16.vlgmr.msra.gmra.mrb[4].mxu0 %v861_v1  ;;  %1049 = vmatprep.subr.bf16.mxu1 %v1159_v42  ;;  %v856_v10 = vld [vmem:[%s1453_s2] ss:$0 sm:$0xff]  ;;  %v1134_v36 = vld [vmem:[%s1456_s5 + $0x18] sm:$0xff]   ;;  %s848_s5 = sshll.u32 %s1161_s24, 4  ;;  %s849_s5 = int_to_ptr.vmem [resolvable:$true] %s848_s5 }
  0x43   :  { %1045 = vmatprep.mubr.msk.bf16.mxu0 %vm1160_vm0, %v1159_v42  ;;  %1038 = vmatpush3.bf16.msra.mxu0 %v1127_v3  ;;  %v920_v37 = vld [vmem:[%s1455_s4] ss:$0 sm:$0xff]  ;;  %s1135_s4 = scalar_lea.vmem %s849_s5, 128  ;;  %p1140_p1 = scmp.lt.s32.totalorder %s849_s5, %s849_s5 }
  0x44   :  { %1034 = vmatmul.mubr.bf16.vlgmr.msra.gmra.mrb[4].mxu1 %v1126_v2  ;;  %1039 = vmatprep.subr.bf16.mxu0 %v1159_v42  ;;  %p1136_p0 = scmp.ne.s32.totalorder %s849_s5, %s1135_s4  ;;  %p1141_p2 = scmp.lt.s32.totalorder %s1135_s4, %s1135_s4 }
  0x45   :  { %1057 = vmatprep.mubr.msk.bf16.mxu1 %vm1160_vm0, %v1159_v42  ;;  %1050 = vmatpush3.bf16.msra.mxu1 %v1131_v7 }
  0x46   :  { %1051 = vmatprep.subr.bf16.mxu1 %v1159_v42  ;;  %p1142_p3 = por %p1141_p2, %p1140_p1 }
  0x47   :  { %1040 = vmatpush3.bf16.msra.mxu0 %v1128_v4 }
  0x48   :  { %1041 = vmatprep.subr.bf16.mxu0 %v1159_v42  ;;  %p1143_p4 = pnand %p1142_p3, %p1136_p0 }
  0x49   :  { %1052 = vmatpush3.bf16.msra.mxu1 %v1132_v8 }
  0x4a   :  { %1053 = vmatprep.subr.bf16.mxu1 %v1159_v42 }
  0x4b   :  { %1042 = vmatpush3.bf16.msra.mxu0 %v1129_v5 }
  0x4c   :  { %1043 = vmatprep.subr.bf16.mxu0 %v1159_v42 }
  0x4d   :  { %1054 = vmatpush3.bf16.msra.mxu1 %v1133_v35 }
  0x4e   :  { %1055 = vmatprep.subr.bf16.mxu1 %v1159_v42  ;;  %v926_v42 = vld [vmem:[%s1457_s6] ss:$0 sm:$0xff] }
  0x4f   :  { %1044 = vmatpush3.bf16.msra.mxu0 %v1130_v6 }
  0x51   :  { %1056 = vmatpush3.bf16.msra.mxu1 %v1134_v36 }
  0xf5   :  { %v948_v9 = vpop.f32.mrb[0].mxu0 }
  0xf6   :  { %v949_v11 = vpop.f32.mrb[1].mxu0 }
  0xf7   :  { %v950_v12 = vadd.f32 %v949_v11, %v948_v9  ;;  %v951_v13 = vpop.f32.mrb[2].mxu0  ;;  %v970_v14 = vpop.f32.mrb[0].mxu1 }
  0xf8   :  { %v952_v15 = vpop.f32.mrb[3].mxu0  ;;  %v971_v16 = vpop.f32.mrb[1].mxu1 }
  0xf9   :  { %v547_v17 = vadd.f32 %v950_v12, %v856_v10  ;;  %v972_v18 = vadd.f32 %v971_v16, %v970_v14  ;;  %v973_v19 = vpop.f32.mrb[2].mxu1 }
  0xfa   :  { %v974_v20 = vpop.f32.mrb[3].mxu1 }
  0xfb   :  { %v587_v21 = vadd.f32 %v972_v18, %v547_v17 }
 0x115   :  { %v992_v22 = vpop.f32.mrb[4].mxu0 }
 0x116   :  { %v993_v23 = vpop.f32.mrb[5].mxu0 }
 0x117   :  { %v994_v24 = vadd.f32 %v993_v23, %v992_v22  ;;  %v995_v25 = vpop.f32.mrb[6].mxu0  ;;  %v666_v26 = vpop.f32.mrb[4].mxu1 }
 0x118   :  { %v996_v27 = vpop.f32.mrb[7].mxu0  ;;  %v1035_v28 = vpop.f32.mrb[5].mxu1 }
 0x119   :  { %v627_v29 = vadd.f32 %v994_v24, %v587_v21  ;;  %v669_v30 = vpop.f32.mrb[6].mxu1 }
 0x11a   :  { %v1036_v31 = vpop.f32.mrb[7].mxu1 }
 0x11b   :  { %v667_v32 = vadd.f32 %v666_v26, %v627_v29 }
 0x11d   :  { %v672_v33 = vmax.f32 %v667_v32, 0.0 }
 0x11f   :  { %v673_v34 = vpack.c.bf16 %v672_v33, %v672_v33 }
 0x121   :  { %1046 = vmatmul.mubr.msk.bf16.vlgmr.msra.gmra.mrb[8].mxu0 %vm713_vm1, %v673_v34 }
 0x1f4   :  { %v751_v38 = vpop.f32.mrb[8].mxu0 }
 0x1f5   :  { %v752_v39 = vadd.f32 %v920_v37, %v751_v38  ;;  %v1047_v40 = vpop.f32.mrb[9].mxu0 }
 0x1f6   :  { %v754_v41 = vpop.f32.mrb[10].mxu0 }
 0x1f7   :  { %v757_v43 = vmax.f32 %v752_v39, 0.0  ;;  %v1048_v44 = vpop.f32.mrb[11].mxu0 }
 0x1f9   :  { %v758_v45 = vpack.c.bf16 %v757_v43, %v757_v43 }
 0x1fb   :  { %1058 = vmatmul.mubr.msk.bf16.vlgmr.msra.gmra.mrb[8].mxu1 %vm713_vm1, %v758_v45 }
 0x2ce   :  { %v835_v46 = vpop.f32.mrb[8].mxu1 }
 0x2cf   :  { %v836_v47 = vadd.f32 %v926_v42, %v835_v46  ;;  %v1059_v48 = vpop.f32.mrb[9].mxu1 }
 0x2d0   :  { %v838_v49 = vpop.f32.mrb[10].mxu1 }
 0x2d1   :  { %841 = vst [vmem:[#allocation2] sm:$0xff] %v836_v47  ;;  %v1060_v50 = vpop.f32.mrb[11].mxu1 }
 0x2d2   :  { %1146 = shalt.err (!%p1143_p4)
}
 0x2d3   :  { %s1147_s6 = scalar_lea.hbm %s1458_s7, 128 }
 0x2d4   :  { %p1148_p5 = scmp.ne.s32.totalorder %s1458_s7, %s1147_s6  ;;  %p1151_p6 = scmp.lt.u32.totalorder %s1147_s6, %s1458_s7 }
 0x2d6   :  { %p1153_p7 = pnand %p1151_p6, %p1148_p5 }
 0x2d8   :  { %1156 = shalt.err (!%p1153_p7)
}
 0x2d9   :  { %851 = dma.vmem_to_hbm [thread:$0]  %s849_s5, 128, %s1458_s7, [#allocation3]  }
 0x2da   :  { %1157 = dma.done.wait [#allocation3], 128  }
 0x2db   :  { %1158 = vsyncadd [#allocation3], 4294967168 }
 0x2dc   :  { %855 = vsyncpa [#allocation3], 1 }

</bundles_post_ra>
